<compile_context>
chip_gen: v6e
topology: v6e:2x2x1
jax: 0.10.0
libtpu: 0.0.40
codegen_flags: <defaults>
</compile_context>

<pallas_src>
import math
import functools

import jax
import jax.numpy as jnp
from jax import lax
from jax.experimental import pallas as pl
from jax.experimental.pallas import tpu as pltpu


# Python floats only (never jnp scalars) -> nothing gets captured as a const.
_NEG_BIG = -1.0e30            # finite "-inf": robust for fully-masked rows
_INV_SQRT2 = 0.7071067811865476


def _layernorm(x, g, b, eps=1e-12):
    mean = jnp.mean(x, axis=-1, keepdims=True)
    var = jnp.mean((x - mean) ** 2, axis=-1, keepdims=True)   # biased, like torch LN
    return (x - mean) * lax.rsqrt(var + eps) * g + b


def _gelu(x):
    # exact gelu (erf form), matching transformers' `gelu`
    return 0.5 * x * (1.0 + lax.erf(x * _INV_SQRT2))


def transformer_block_kernel(n_heads, hid_tile, kv_tile,
                             x_ref, mask_ref,
                             wqkv_ref, bqkv_ref, wo_ref,
                             w1_ref, b1_ref, w2_ref,
                             vec_ref,
                             out_ref):
    bt, seq, dim = x_ref.shape
    dph = dim // n_heads
    m_rows = bt * seq
    hidden = w1_ref.shape[1]

    # Packed per-channel vectors (one (8, dim) slab -> single block/DMA).
    bo = vec_ref[0:1, :]
    ln1_g = vec_ref[1:2, :]
    ln1_b = vec_ref[2:3, :]
    b2 = vec_ref[3:4, :]
    ln2_g = vec_ref[4:5, :]
    ln2_b = vec_ref[5:6, :]

    # Fold batch into the M (sublane) axis for all position-wise math.
    x2 = x_ref[...].reshape(m_rows, dim)          # residuals / LN stay f32
    x2_bf = x2.astype(jnp.bfloat16)

    # --- fused QKV projection: one (m, dim) x (dim, 3*dim) MXU matmul.
    #     Weights are pre-transposed to (in, out); Q columns/bias pre-scaled
    #     by 1/sqrt(dph) in the wrapper. ---
    qkv = jnp.dot(x2_bf, wqkv_ref[...], preferred_element_type=jnp.float32)
    qkv = qkv + bqkv_ref[...]
    q3 = qkv[:, 0 * dim:1 * dim].reshape(bt, seq, dim).astype(jnp.bfloat16)
    k3 = qkv[:, 1 * dim:2 * dim].reshape(bt, seq, dim).astype(jnp.bfloat16)
    v3 = qkv[:, 2 * dim:3 * dim].reshape(bt, seq, dim).astype(jnp.bfloat16)

    # mask is a 0/1 float mask (bs, 1, seq); exact compare is fine for 0/1.
    mask0 = mask_ref[...] == 0                    # (bt, 1, seq) bool

    dn_qk = (((2,), (2,)), ((0,), (0,)))          # contract head dims, batch over bt
    dn_pv = (((2,), (1,)), ((0,), (0,)))

    # --- attention: per head, online-softmax over KV tiles; the per-head
    #     context is folded straight into the output projection (no ctx
    #     scratch, no 64-lane masked stores, no concat). ---
    sa = None
    for h in range(n_heads):
        sl = slice(h * dph, (h + 1) * dph)
        q_h = q3[:, :, sl]
        k_h = k3[:, :, sl]
        v_h = v3[:, :, sl]

        m_run = None
        l_run = None
        acc = None
        for c0 in range(0, seq, kv_tile):
            c1 = min(c0 + kv_tile, seq)
            s = lax.dot_general(q_h, k_h[:, c0:c1, :], dn_qk,
                                preferred_element_type=jnp.float32)   # (bt, seq, c1-c0)
            s = jnp.where(mask0[:, :, c0:c1], _NEG_BIG, s)
            blk_max = jnp.max(s, axis=-1, keepdims=True)
            m_new = blk_max if m_run is None else jnp.maximum(m_run, blk_max)
            p = jnp.exp(s - m_new)
            psum = jnp.sum(p, axis=-1, keepdims=True)
            pv = lax.dot_general(p.astype(jnp.bfloat16), v_h[:, c0:c1, :], dn_pv,
                                 preferred_element_type=jnp.float32)  # (bt, seq, dph)
            if m_run is None:
                l_run, acc = psum, pv
            else:
                alpha = jnp.exp(m_run - m_new)
                l_run = alpha * l_run + psum
                acc = alpha * acc + pv
            m_run = m_new

        # exact per-row normalization (denominator is only (bt, seq, 1))
        ctx_h = acc * (1.0 / l_run)                                   # (bt, seq, dph) f32
        ctx2 = ctx_h.reshape(m_rows, dph).astype(jnp.bfloat16)
        part = jnp.dot(ctx2, wo_ref[sl, :], preferred_element_type=jnp.float32)
        sa = part if sa is None else sa + part

    # --- output-projection bias + residual + LayerNorm ---
    sa = _layernorm(sa + bo + x2, ln1_g, ln1_b)

    # --- FFN (gelu) tiled over the hidden dim, f32 accumulation ---
    sa_bf = sa.astype(jnp.bfloat16)
    f = None
    for c0 in range(0, hidden, hid_tile):
        c1 = min(c0 + hid_tile, hidden)
        hc = jnp.dot(sa_bf, w1_ref[:, c0:c1],
                     preferred_element_type=jnp.float32) + b1_ref[:, c0:c1]
        hc = _gelu(hc).astype(jnp.bfloat16)
        part = jnp.dot(hc, w2_ref[c0:c1, :], preferred_element_type=jnp.float32)
        f = part if f is None else f + part
    f = f + b2

    out = _layernorm(f + sa, ln2_g, ln2_b)
    out_ref[...] = out.reshape(bt, seq, dim)


def _pick_vmem_limit_bytes():
    """Generation-aware scoped VMEM limit."""
    try:
        kind = jax.devices()[0].device_kind.lower()
    except Exception:
        kind = ""
    if "v7" in kind:
        return 48 * 1024 * 1024        # 64 MiB physical per TC on v7x
    if "tpu" in kind or "v5" in kind or "v6" in kind:
        return 64 * 1024 * 1024        # 128 MiB physical on v5e/v6e
    return 32 * 1024 * 1024            # unknown backend (e.g. interpret): conservative


def _default_batch_tile(bs, seq, dim, hidden, n_heads, kv_tile):
    """Budget live in-kernel intermediates, and keep the grid >= 2 steps."""
    if seq % 8 != 0:
        return 1
    dph = dim // n_heads
    per_elem = (
        4 * seq * dim * 6          # x2 / sa accum / sa / ffn accum / out / slack (f32)
        + 2 * seq * dim * 5        # x2_bf, q3, k3, v3, sa_bf (bf16)
        + 4 * seq * 3 * dim        # fused qkv (f32)
        + 6 * seq * kv_tile        # scores + probs for one head (f32 + bf16)
        + 4 * seq * dph * 2        # running acc / ctx (f32)
    )
    budget = 8 * 1024 * 1024       # leave the rest of VMEM for resident weights
    cap_mem = max(1, budget // max(per_elem, 1))
    cap_grid = max(1, bs // 2) if bs >= 2 else 1   # >=2 grid steps -> v7x 2-TC sharding
    cap = max(1, min(bs, cap_mem, cap_grid))
    bt = 1
    for d in range(1, cap + 1):
        if bs % d == 0:
            bt = d
    return bt


def transformer_block(x, attn_mask, params, n_heads, *,
                      hid_tile=None, kv_tile=None, batch_tile=None):
    bs, seq, dim = x.shape
    hidden = params["w1"].shape[0]
    dph = dim // n_heads
    scale = 1.0 / math.sqrt(dph)
    bf16 = jnp.bfloat16

    if kv_tile is None:
        kv_tile = seq if seq <= 512 else 512
    if hid_tile is None:
        hid_tile = hidden if hidden <= 512 else 512
    if batch_tile is None:
        batch_tile = _default_batch_tile(bs, seq, dim, hidden, n_heads, kv_tile)
    assert bs % batch_tile == 0

    # One-time param prep: pre-transpose weights to (in, out), fuse QKV,
    # fold 1/sqrt(dph) into the Q columns/bias, cast matmul weights to bf16.
    wqkv = jnp.concatenate(
        [params["wq"].T * scale, params["wk"].T, params["wv"].T], axis=1
    ).astype(bf16)                                              # (dim, 3*dim)
    bqkv = jnp.concatenate(
        [params["bq"] * scale, params["bk"], params["bv"]]
    ).reshape(1, 3 * dim).astype(jnp.float32)                   # (1, 3*dim)
    wo_t = params["wo"].T.astype(bf16)                          # (dim, dim)
    w1_t = params["w1"].T.astype(bf16)                          # (dim, hidden)
    w2_t = params["w2"].T.astype(bf16)                          # (hidden, dim)
    b1 = params["b1"].reshape(1, hidden).astype(jnp.float32)

    # Pack the 6 remaining per-channel vectors into one (8, dim) f32 slab.
    vec_slab = jnp.zeros((8, dim), jnp.float32)
    vec_slab = vec_slab.at[0].set(params["bo"].astype(jnp.float32))
    vec_slab = vec_slab.at[1].set(params["ln1_g"].astype(jnp.float32))
    vec_slab = vec_slab.at[2].set(params["ln1_b"].astype(jnp.float32))
    vec_slab = vec_slab.at[3].set(params["b2"].astype(jnp.float32))
    vec_slab = vec_slab.at[4].set(params["ln2_g"].astype(jnp.float32))
    vec_slab = vec_slab.at[5].set(params["ln2_b"].astype(jnp.float32))

    mask3 = attn_mask.astype(jnp.float32).reshape(bs, 1, seq)

    full = lambda shp: pl.BlockSpec(shp, lambda b: (0,) * len(shp))
    in_specs = [
        pl.BlockSpec((batch_tile, seq, dim), lambda b: (b, 0, 0)),   # x
        pl.BlockSpec((batch_tile, 1, seq), lambda b: (b, 0, 0)),     # mask
        full((dim, 3 * dim)), full((1, 3 * dim)),                    # wqkv, bqkv
        full((dim, dim)),                                            # wo_t
        full((dim, hidden)), full((1, hidden)),                      # w1_t, b1
        full((hidden, dim)),                                         # w2_t
        full((8, dim)),                                              # packed vectors
    ]

    kernel = functools.partial(transformer_block_kernel, n_heads, hid_tile, kv_tile)
    return pl.pallas_call(
        kernel,
        out_shape=jax.ShapeDtypeStruct((bs, seq, dim), jnp.float32),
        grid=(bs // batch_tile,),
        in_specs=in_specs,
        out_specs=pl.BlockSpec((batch_tile, seq, dim), lambda b: (b, 0, 0)),
        compiler_params=pltpu.CompilerParams(
            dimension_semantics=("parallel",),
            vmem_limit_bytes=_pick_vmem_limit_bytes(),
        ),
    )(x, mask3, wqkv, bqkv, wo_t, w1_t, b1, w2_t, vec_slab)


def reference_block(x, attn_mask, p, n_heads):
    """Pure-JAX f32 reference mirroring the PyTorch forward."""
    bs, seq, dim = x.shape
    dph = dim // n_heads

    def lin(a, w, b):
        return jnp.einsum("bsd,od->bso", a, w) + b

    q = lin(x, p["wq"], p["bq"]).reshape(bs, seq, n_heads, dph).transpose(0, 2, 1, 3)
    k = lin(x, p["wk"], p["bk"]).reshape(bs, seq, n_heads, dph).transpose(0, 2, 1, 3)
    v = lin(x, p["wv"], p["bv"]).reshape(bs, seq, n_heads, dph).transpose(0, 2, 1, 3)
    q = q / math.sqrt(dph)
    scores = jnp.einsum("bhqd,bhkd->bhqk", q, k)
    m = (attn_mask == 0).reshape(bs, 1, 1, seq)
    scores = jnp.where(m, -jnp.inf, scores)
    w = jax.nn.softmax(scores, axis=-1)
    ctx = jnp.einsum("bhqk,bhkd->bhqd", w, v).transpose(0, 2, 1, 3).reshape(bs, seq, dim)
    sa = lin(ctx, p["wo"], p["bo"])

    def ln(a, g, b):
        mu = a.mean(-1, keepdims=True)
        var = ((a - mu) ** 2).mean(-1, keepdims=True)
        return (a - mu) / jnp.sqrt(var + 1e-12) * g + b

    sa = ln(sa + x, p["ln1_g"], p["ln1_b"])
    h = lin(sa, p["w1"], p["b1"])
    h = 0.5 * h * (1.0 + lax.erf(h / math.sqrt(2.0)))
    f = lin(h, p["w2"], p["b2"])
    return ln(f + sa, p["ln2_g"], p["ln2_b"])


if __name__ == "__main__":
    bs, seq, dim, n_heads, hidden = 2, 8, 32, 4, 64

    key = jax.random.PRNGKey(0)
    keys = jax.random.split(key, 12)

    x = jax.random.normal(keys[0], (bs, seq, dim), dtype=jnp.float32)
    attn_mask = (jax.random.uniform(keys[1], (bs, seq)) > 0.3).astype(jnp.int32)
    attn_mask = attn_mask.at[:, 0].set(1)  # ensure no fully-masked rows

    def w(k, shape):
        return 0.02 * jax.random.normal(k, shape, dtype=jnp.float32)

    params = {
        "wq": w(keys[2], (dim, dim)),  "bq": w(keys[3], (dim,)),
        "wk": w(keys[4], (dim, dim)),  "bk": w(keys[5], (dim,)),
        "wv": w(keys[6], (dim, dim)),  "bv": w(keys[7], (dim,)),
        "wo": w(keys[8], (dim, dim)),  "bo": w(keys[9], (dim,)),
        "ln1_g": jnp.ones((dim,), jnp.float32), "ln1_b": jnp.zeros((dim,), jnp.float32),
        "w1": w(keys[10], (hidden, dim)), "b1": jnp.zeros((hidden,), jnp.float32),
        "w2": w(keys[11], (dim, hidden)), "b2": jnp.zeros((dim,), jnp.float32),
        "ln2_g": jnp.ones((dim,), jnp.float32), "ln2_b": jnp.zeros((dim,), jnp.float32),
    }

    out = transformer_block(x, attn_mask, params, n_heads)
    out = jax.block_until_ready(out)

    ref = jax.block_until_ready(reference_block(x, attn_mask, params, n_heads))
    assert out.shape == (bs, seq, dim)
    # bf16 matmul operands (f32 accumulation) -> looser tolerance than pure f32
    assert bool(jnp.allclose(out, ref, atol=3e-2, rtol=3e-2)), "mismatch vs reference"

    print("KERNEL_OK")
</pallas_src>

<mosaic_0001>
module attributes {stable_mosaic.version = 11 : i64} {
  func.func @transformer_block_kernel(%arg0: i32, %arg1: memref<1x8x32xf32, #tpu.memory_space<vmem>>, %arg2: memref<1x1x8xf32, #tpu.memory_space<vmem>>, %arg3: memref<32x96xbf16, #tpu.memory_space<vmem>>, %arg4: memref<1x96xf32, #tpu.memory_space<vmem>>, %arg5: memref<32x32xbf16, #tpu.memory_space<vmem>>, %arg6: memref<32x64xbf16, #tpu.memory_space<vmem>>, %arg7: memref<1x64xf32, #tpu.memory_space<vmem>>, %arg8: memref<64x32xbf16, #tpu.memory_space<vmem>>, %arg9: memref<8x32xf32, #tpu.memory_space<vmem>>, %arg10: memref<1x8x32xf32, #tpu.memory_space<vmem>>) attributes {dimension_semantics = [#tpu.dimension_semantics<parallel>], iteration_bounds = array<i64: 2>, scalar_prefetch = 0 : i64, scratch_operands = 0 : i64, tpu.core_type = #tpu.core_type<tc>, window_params = [{transform_indices = @transform_0, window_bounds = array<i64: 1, 8, 32>}, {transform_indices = @transform_1, window_bounds = array<i64: 1, 1, 8>}, {pipeline_mode = #tpu.pipeline_mode<synchronous>, transform_indices = @transform_2, window_bounds = array<i64: 32, 96>}, {pipeline_mode = #tpu.pipeline_mode<synchronous>, transform_indices = @transform_3, window_bounds = array<i64: 1, 96>}, {pipeline_mode = #tpu.pipeline_mode<synchronous>, transform_indices = @transform_4, window_bounds = array<i64: 32, 32>}, {pipeline_mode = #tpu.pipeline_mode<synchronous>, transform_indices = @transform_5, window_bounds = array<i64: 32, 64>}, {pipeline_mode = #tpu.pipeline_mode<synchronous>, transform_indices = @transform_6, window_bounds = array<i64: 1, 64>}, {pipeline_mode = #tpu.pipeline_mode<synchronous>, transform_indices = @transform_7, window_bounds = array<i64: 64, 32>}, {pipeline_mode = #tpu.pipeline_mode<synchronous>, transform_indices = @transform_8, window_bounds = array<i64: 8, 32>}, {transform_indices = @transform_9, window_bounds = array<i64: 1, 8, 32>}]} {
    %c0 = arith.constant 0 : index
    %c0_0 = arith.constant 0 : index
    %0 = vector.load %arg9[%c0, %c0_0] : memref<8x32xf32, #tpu.memory_space<vmem>>, vector<1x32xf32>
    %c1 = arith.constant 1 : index
    %c0_1 = arith.constant 0 : index
    %1 = vector.load %arg9[%c1, %c0_1] : memref<8x32xf32, #tpu.memory_space<vmem>>, vector<1x32xf32>
    %c2 = arith.constant 2 : index
    %c0_2 = arith.constant 0 : index
    %2 = vector.load %arg9[%c2, %c0_2] : memref<8x32xf32, #tpu.memory_space<vmem>>, vector<1x32xf32>
    %c3 = arith.constant 3 : index
    %c0_3 = arith.constant 0 : index
    %3 = vector.load %arg9[%c3, %c0_3] : memref<8x32xf32, #tpu.memory_space<vmem>>, vector<1x32xf32>
    %c4 = arith.constant 4 : index
    %c0_4 = arith.constant 0 : index
    %4 = vector.load %arg9[%c4, %c0_4] : memref<8x32xf32, #tpu.memory_space<vmem>>, vector<1x32xf32>
    %c5 = arith.constant 5 : index
    %c0_5 = arith.constant 0 : index
    %5 = vector.load %arg9[%c5, %c0_5] : memref<8x32xf32, #tpu.memory_space<vmem>>, vector<1x32xf32>
    %c0_6 = arith.constant 0 : index
    %c0_7 = arith.constant 0 : index
    %c0_8 = arith.constant 0 : index
    %6 = vector.load %arg1[%c0_6, %c0_7, %c0_8] : memref<1x8x32xf32, #tpu.memory_space<vmem>>, vector<1x8x32xf32>
    %7 = vector.shape_cast %6 : vector<1x8x32xf32> to vector<8x32xf32>
    %8 = arith.truncf %7 : vector<8x32xf32> to vector<8x32xbf16>
    %c0_9 = arith.constant 0 : index
    %c0_10 = arith.constant 0 : index
    %9 = vector.load %arg3[%c0_9, %c0_10] : memref<32x96xbf16, #tpu.memory_space<vmem>>, vector<32x96xbf16>
    %cst = arith.constant dense<0.000000e+00> : vector<8x96xf32>
    %10 = tpu.matmul %8, %9, %cst {dimension_numbers = #tpu.dot_dimension_numbers<[1], [0], [0], [1], [0, 0, 1, 1], [], []>} : vector<8x32xbf16>, vector<32x96xbf16>, vector<8x96xf32> -> vector<8x96xf32>
    %c0_11 = arith.constant 0 : index
    %c0_12 = arith.constant 0 : index
    %11 = vector.load %arg4[%c0_11, %c0_12] : memref<1x96xf32, #tpu.memory_space<vmem>>, vector<1x96xf32>
    %12 = vector.broadcast %11 : vector<1x96xf32> to vector<8x96xf32>
    %13 = arith.addf %10, %12 : vector<8x96xf32>
    %14 = vector.extract_strided_slice %13 {offsets = [0, 0], sizes = [8, 32], strides = [1, 1]} : vector<8x96xf32> to vector<8x32xf32>
    %15 = vector.shape_cast %14 : vector<8x32xf32> to vector<1x8x32xf32>
    %16 = arith.truncf %15 : vector<1x8x32xf32> to vector<1x8x32xbf16>
    %17 = vector.extract_strided_slice %13 {offsets = [0, 32], sizes = [8, 32], strides = [1, 1]} : vector<8x96xf32> to vector<8x32xf32>
    %18 = vector.shape_cast %17 : vector<8x32xf32> to vector<1x8x32xf32>
    %19 = arith.truncf %18 : vector<1x8x32xf32> to vector<1x8x32xbf16>
    %20 = vector.extract_strided_slice %13 {offsets = [0, 64], sizes = [8, 32], strides = [1, 1]} : vector<8x96xf32> to vector<8x32xf32>
    %21 = vector.shape_cast %20 : vector<8x32xf32> to vector<1x8x32xf32>
    %22 = arith.truncf %21 : vector<1x8x32xf32> to vector<1x8x32xbf16>
    %c0_13 = arith.constant 0 : index
    %c0_14 = arith.constant 0 : index
    %c0_15 = arith.constant 0 : index
    %23 = vector.load %arg2[%c0_13, %c0_14, %c0_15] : memref<1x1x8xf32, #tpu.memory_space<vmem>>, vector<1x1x8xf32>
    %cst_16 = arith.constant 0.000000e+00 : f32
    %24 = vector.broadcast %cst_16 : f32 to vector<1x1x8xf32>
    %25 = arith.cmpf oeq, %23, %24 : vector<1x1x8xf32>
    %26 = vector.extract_strided_slice %16 {offsets = [0, 0, 0], sizes = [1, 8, 8], strides = [1, 1, 1]} : vector<1x8x32xbf16> to vector<1x8x8xbf16>
    %27 = vector.extract_strided_slice %19 {offsets = [0, 0, 0], sizes = [1, 8, 8], strides = [1, 1, 1]} : vector<1x8x32xbf16> to vector<1x8x8xbf16>
    %28 = vector.extract_strided_slice %22 {offsets = [0, 0, 0], sizes = [1, 8, 8], strides = [1, 1, 1]} : vector<1x8x32xbf16> to vector<1x8x8xbf16>
    %cst_17 = arith.constant dense<0.000000e+00> : vector<1x8x8xf32>
    %29 = tpu.matmul %26, %27, %cst_17 {dimension_numbers = #tpu.dot_dimension_numbers<[2], [2], [1], [1], [0, 0, 0, 1, 1, 1], [0], [0]>} : vector<1x8x8xbf16>, vector<1x8x8xbf16>, vector<1x8x8xf32> -> vector<1x8x8xf32>
    %cst_18 = arith.constant -1.000000e+30 : f32
    %30 = vector.shape_cast %25 : vector<1x1x8xi1> to vector<1x1x8xi1>
    %31 = vector.broadcast %30 : vector<1x1x8xi1> to vector<1x8x8xi1>
    %32 = vector.broadcast %cst_18 : f32 to vector<1x8x8xf32>
    %33 = arith.select %31, %32, %29 : vector<1x8x8xi1>, vector<1x8x8xf32>
    %cst_19 = arith.constant dense<0xFF800000> : vector<1x8xf32>
    %34 = vector.multi_reduction <maximumf>, %33, %cst_19 [2] : vector<1x8x8xf32> to vector<1x8xf32>
    %35 = vector.shape_cast %34 : vector<1x8xf32> to vector<1x8x1xf32>
    %36 = vector.broadcast %35 : vector<1x8x1xf32> to vector<1x8x8xf32>
    %37 = arith.subf %33, %36 : vector<1x8x8xf32>
    %38 = math.exp %37 : vector<1x8x8xf32>
    %cst_20 = arith.constant dense<0.000000e+00> : vector<1x8xf32>
    %39 = vector.multi_reduction <add>, %38, %cst_20 [2] : vector<1x8x8xf32> to vector<1x8xf32>
    %40 = vector.shape_cast %39 : vector<1x8xf32> to vector<1x8x1xf32>
    %41 = arith.truncf %38 : vector<1x8x8xf32> to vector<1x8x8xbf16>
    %cst_21 = arith.constant dense<0.000000e+00> : vector<1x8x8xf32>
    %42 = tpu.matmul %41, %28, %cst_21 {dimension_numbers = #tpu.dot_dimension_numbers<[2], [1], [1], [2], [0, 0, 0, 1, 1, 2], [0], [0]>} : vector<1x8x8xbf16>, vector<1x8x8xbf16>, vector<1x8x8xf32> -> vector<1x8x8xf32>
    %cst_22 = arith.constant 1.000000e+00 : f32
    %43 = vector.broadcast %cst_22 : f32 to vector<1x8x1xf32>
    %44 = arith.divf %43, %40 : vector<1x8x1xf32>
    %45 = vector.broadcast %44 : vector<1x8x1xf32> to vector<1x8x8xf32>
    %46 = arith.mulf %42, %45 : vector<1x8x8xf32>
    %47 = vector.shape_cast %46 : vector<1x8x8xf32> to vector<8x8xf32>
    %48 = arith.truncf %47 : vector<8x8xf32> to vector<8x8xbf16>
    %c0_23 = arith.constant 0 : index
    %c0_24 = arith.constant 0 : index
    %49 = vector.load %arg5[%c0_23, %c0_24] : memref<32x32xbf16, #tpu.memory_space<vmem>>, vector<8x32xbf16>
    %cst_25 = arith.constant dense<0.000000e+00> : vector<8x32xf32>
    %50 = tpu.matmul %48, %49, %cst_25 {dimension_numbers = #tpu.dot_dimension_numbers<[1], [0], [0], [1], [0, 0, 1, 1], [], []>} : vector<8x8xbf16>, vector<8x32xbf16>, vector<8x32xf32> -> vector<8x32xf32>
    %51 = vector.extract_strided_slice %16 {offsets = [0, 0, 8], sizes = [1, 8, 8], strides = [1, 1, 1]} : vector<1x8x32xbf16> to vector<1x8x8xbf16>
    %52 = vector.extract_strided_slice %19 {offsets = [0, 0, 8], sizes = [1, 8, 8], strides = [1, 1, 1]} : vector<1x8x32xbf16> to vector<1x8x8xbf16>
    %53 = vector.extract_strided_slice %22 {offsets = [0, 0, 8], sizes = [1, 8, 8], strides = [1, 1, 1]} : vector<1x8x32xbf16> to vector<1x8x8xbf16>
    %cst_26 = arith.constant dense<0.000000e+00> : vector<1x8x8xf32>
    %54 = tpu.matmul %51, %52, %cst_26 {dimension_numbers = #tpu.dot_dimension_numbers<[2], [2], [1], [1], [0, 0, 0, 1, 1, 1], [0], [0]>} : vector<1x8x8xbf16>, vector<1x8x8xbf16>, vector<1x8x8xf32> -> vector<1x8x8xf32>
    %cst_27 = arith.constant -1.000000e+30 : f32
    %55 = vector.shape_cast %25 : vector<1x1x8xi1> to vector<1x1x8xi1>
    %56 = vector.broadcast %55 : vector<1x1x8xi1> to vector<1x8x8xi1>
    %57 = vector.broadcast %cst_27 : f32 to vector<1x8x8xf32>
    %58 = arith.select %56, %57, %54 : vector<1x8x8xi1>, vector<1x8x8xf32>
    %cst_28 = arith.constant dense<0xFF800000> : vector<1x8xf32>
    %59 = vector.multi_reduction <maximumf>, %58, %cst_28 [2] : vector<1x8x8xf32> to vector<1x8xf32>
    %60 = vector.shape_cast %59 : vector<1x8xf32> to vector<1x8x1xf32>
    %61 = vector.broadcast %60 : vector<1x8x1xf32> to vector<1x8x8xf32>
    %62 = arith.subf %58, %61 : vector<1x8x8xf32>
    %63 = math.exp %62 : vector<1x8x8xf32>
    %cst_29 = arith.constant dense<0.000000e+00> : vector<1x8xf32>
    %64 = vector.multi_reduction <add>, %63, %cst_29 [2] : vector<1x8x8xf32> to vector<1x8xf32>
    %65 = vector.shape_cast %64 : vector<1x8xf32> to vector<1x8x1xf32>
    %66 = arith.truncf %63 : vector<1x8x8xf32> to vector<1x8x8xbf16>
    %cst_30 = arith.constant dense<0.000000e+00> : vector<1x8x8xf32>
    %67 = tpu.matmul %66, %53, %cst_30 {dimension_numbers = #tpu.dot_dimension_numbers<[2], [1], [1], [2], [0, 0, 0, 1, 1, 2], [0], [0]>} : vector<1x8x8xbf16>, vector<1x8x8xbf16>, vector<1x8x8xf32> -> vector<1x8x8xf32>
    %cst_31 = arith.constant 1.000000e+00 : f32
    %68 = vector.broadcast %cst_31 : f32 to vector<1x8x1xf32>
    %69 = arith.divf %68, %65 : vector<1x8x1xf32>
    %70 = vector.broadcast %69 : vector<1x8x1xf32> to vector<1x8x8xf32>
    %71 = arith.mulf %67, %70 : vector<1x8x8xf32>
    %72 = vector.shape_cast %71 : vector<1x8x8xf32> to vector<8x8xf32>
    %73 = arith.truncf %72 : vector<8x8xf32> to vector<8x8xbf16>
    %c8 = arith.constant 8 : index
    %c0_32 = arith.constant 0 : index
    %74 = vector.load %arg5[%c8, %c0_32] : memref<32x32xbf16, #tpu.memory_space<vmem>>, vector<8x32xbf16>
    %cst_33 = arith.constant dense<0.000000e+00> : vector<8x32xf32>
    %75 = tpu.matmul %73, %74, %cst_33 {dimension_numbers = #tpu.dot_dimension_numbers<[1], [0], [0], [1], [0, 0, 1, 1], [], []>} : vector<8x8xbf16>, vector<8x32xbf16>, vector<8x32xf32> -> vector<8x32xf32>
    %76 = arith.addf %50, %75 : vector<8x32xf32>
    %77 = vector.extract_strided_slice %16 {offsets = [0, 0, 16], sizes = [1, 8, 8], strides = [1, 1, 1]} : vector<1x8x32xbf16> to vector<1x8x8xbf16>
    %78 = vector.extract_strided_slice %19 {offsets = [0, 0, 16], sizes = [1, 8, 8], strides = [1, 1, 1]} : vector<1x8x32xbf16> to vector<1x8x8xbf16>
    %79 = vector.extract_strided_slice %22 {offsets = [0, 0, 16], sizes = [1, 8, 8], strides = [1, 1, 1]} : vector<1x8x32xbf16> to vector<1x8x8xbf16>
    %cst_34 = arith.constant dense<0.000000e+00> : vector<1x8x8xf32>
    %80 = tpu.matmul %77, %78, %cst_34 {dimension_numbers = #tpu.dot_dimension_numbers<[2], [2], [1], [1], [0, 0, 0, 1, 1, 1], [0], [0]>} : vector<1x8x8xbf16>, vector<1x8x8xbf16>, vector<1x8x8xf32> -> vector<1x8x8xf32>
    %cst_35 = arith.constant -1.000000e+30 : f32
    %81 = vector.shape_cast %25 : vector<1x1x8xi1> to vector<1x1x8xi1>
    %82 = vector.broadcast %81 : vector<1x1x8xi1> to vector<1x8x8xi1>
    %83 = vector.broadcast %cst_35 : f32 to vector<1x8x8xf32>
    %84 = arith.select %82, %83, %80 : vector<1x8x8xi1>, vector<1x8x8xf32>
    %cst_36 = arith.constant dense<0xFF800000> : vector<1x8xf32>
    %85 = vector.multi_reduction <maximumf>, %84, %cst_36 [2] : vector<1x8x8xf32> to vector<1x8xf32>
    %86 = vector.shape_cast %85 : vector<1x8xf32> to vector<1x8x1xf32>
    %87 = vector.broadcast %86 : vector<1x8x1xf32> to vector<1x8x8xf32>
    %88 = arith.subf %84, %87 : vector<1x8x8xf32>
    %89 = math.exp %88 : vector<1x8x8xf32>
    %cst_37 = arith.constant dense<0.000000e+00> : vector<1x8xf32>
    %90 = vector.multi_reduction <add>, %89, %cst_37 [2] : vector<1x8x8xf32> to vector<1x8xf32>
    %91 = vector.shape_cast %90 : vector<1x8xf32> to vector<1x8x1xf32>
    %92 = arith.truncf %89 : vector<1x8x8xf32> to vector<1x8x8xbf16>
    %cst_38 = arith.constant dense<0.000000e+00> : vector<1x8x8xf32>
    %93 = tpu.matmul %92, %79, %cst_38 {dimension_numbers = #tpu.dot_dimension_numbers<[2], [1], [1], [2], [0, 0, 0, 1, 1, 2], [0], [0]>} : vector<1x8x8xbf16>, vector<1x8x8xbf16>, vector<1x8x8xf32> -> vector<1x8x8xf32>
    %cst_39 = arith.constant 1.000000e+00 : f32
    %94 = vector.broadcast %cst_39 : f32 to vector<1x8x1xf32>
    %95 = arith.divf %94, %91 : vector<1x8x1xf32>
    %96 = vector.broadcast %95 : vector<1x8x1xf32> to vector<1x8x8xf32>
    %97 = arith.mulf %93, %96 : vector<1x8x8xf32>
    %98 = vector.shape_cast %97 : vector<1x8x8xf32> to vector<8x8xf32>
    %99 = arith.truncf %98 : vector<8x8xf32> to vector<8x8xbf16>
    %c16 = arith.constant 16 : index
    %c0_40 = arith.constant 0 : index
    %100 = vector.load %arg5[%c16, %c0_40] : memref<32x32xbf16, #tpu.memory_space<vmem>>, vector<8x32xbf16>
    %cst_41 = arith.constant dense<0.000000e+00> : vector<8x32xf32>
    %101 = tpu.matmul %99, %100, %cst_41 {dimension_numbers = #tpu.dot_dimension_numbers<[1], [0], [0], [1], [0, 0, 1, 1], [], []>} : vector<8x8xbf16>, vector<8x32xbf16>, vector<8x32xf32> -> vector<8x32xf32>
    %102 = arith.addf %76, %101 : vector<8x32xf32>
    %103 = vector.extract_strided_slice %16 {offsets = [0, 0, 24], sizes = [1, 8, 8], strides = [1, 1, 1]} : vector<1x8x32xbf16> to vector<1x8x8xbf16>
    %104 = vector.extract_strided_slice %19 {offsets = [0, 0, 24], sizes = [1, 8, 8], strides = [1, 1, 1]} : vector<1x8x32xbf16> to vector<1x8x8xbf16>
    %105 = vector.extract_strided_slice %22 {offsets = [0, 0, 24], sizes = [1, 8, 8], strides = [1, 1, 1]} : vector<1x8x32xbf16> to vector<1x8x8xbf16>
    %cst_42 = arith.constant dense<0.000000e+00> : vector<1x8x8xf32>
    %106 = tpu.matmul %103, %104, %cst_42 {dimension_numbers = #tpu.dot_dimension_numbers<[2], [2], [1], [1], [0, 0, 0, 1, 1, 1], [0], [0]>} : vector<1x8x8xbf16>, vector<1x8x8xbf16>, vector<1x8x8xf32> -> vector<1x8x8xf32>
    %cst_43 = arith.constant -1.000000e+30 : f32
    %107 = vector.shape_cast %25 : vector<1x1x8xi1> to vector<1x1x8xi1>
    %108 = vector.broadcast %107 : vector<1x1x8xi1> to vector<1x8x8xi1>
    %109 = vector.broadcast %cst_43 : f32 to vector<1x8x8xf32>
    %110 = arith.select %108, %109, %106 : vector<1x8x8xi1>, vector<1x8x8xf32>
    %cst_44 = arith.constant dense<0xFF800000> : vector<1x8xf32>
    %111 = vector.multi_reduction <maximumf>, %110, %cst_44 [2] : vector<1x8x8xf32> to vector<1x8xf32>
    %112 = vector.shape_cast %111 : vector<1x8xf32> to vector<1x8x1xf32>
    %113 = vector.broadcast %112 : vector<1x8x1xf32> to vector<1x8x8xf32>
    %114 = arith.subf %110, %113 : vector<1x8x8xf32>
    %115 = math.exp %114 : vector<1x8x8xf32>
    %cst_45 = arith.constant dense<0.000000e+00> : vector<1x8xf32>
    %116 = vector.multi_reduction <add>, %115, %cst_45 [2] : vector<1x8x8xf32> to vector<1x8xf32>
    %117 = vector.shape_cast %116 : vector<1x8xf32> to vector<1x8x1xf32>
    %118 = arith.truncf %115 : vector<1x8x8xf32> to vector<1x8x8xbf16>
    %cst_46 = arith.constant dense<0.000000e+00> : vector<1x8x8xf32>
    %119 = tpu.matmul %118, %105, %cst_46 {dimension_numbers = #tpu.dot_dimension_numbers<[2], [1], [1], [2], [0, 0, 0, 1, 1, 2], [0], [0]>} : vector<1x8x8xbf16>, vector<1x8x8xbf16>, vector<1x8x8xf32> -> vector<1x8x8xf32>
    %cst_47 = arith.constant 1.000000e+00 : f32
    %120 = vector.broadcast %cst_47 : f32 to vector<1x8x1xf32>
    %121 = arith.divf %120, %117 : vector<1x8x1xf32>
    %122 = vector.broadcast %121 : vector<1x8x1xf32> to vector<1x8x8xf32>
    %123 = arith.mulf %119, %122 : vector<1x8x8xf32>
    %124 = vector.shape_cast %123 : vector<1x8x8xf32> to vector<8x8xf32>
    %125 = arith.truncf %124 : vector<8x8xf32> to vector<8x8xbf16>
    %c24 = arith.constant 24 : index
    %c0_48 = arith.constant 0 : index
    %126 = vector.load %arg5[%c24, %c0_48] : memref<32x32xbf16, #tpu.memory_space<vmem>>, vector<8x32xbf16>
    %cst_49 = arith.constant dense<0.000000e+00> : vector<8x32xf32>
    %127 = tpu.matmul %125, %126, %cst_49 {dimension_numbers = #tpu.dot_dimension_numbers<[1], [0], [0], [1], [0, 0, 1, 1], [], []>} : vector<8x8xbf16>, vector<8x32xbf16>, vector<8x32xf32> -> vector<8x32xf32>
    %128 = arith.addf %102, %127 : vector<8x32xf32>
    %129 = vector.broadcast %0 : vector<1x32xf32> to vector<8x32xf32>
    %130 = arith.addf %128, %129 : vector<8x32xf32>
    %131 = arith.addf %130, %7 : vector<8x32xf32>
    %cst_50 = arith.constant dense<0.000000e+00> : vector<8xf32>
    %132 = vector.multi_reduction <add>, %131, %cst_50 [1] : vector<8x32xf32> to vector<8xf32>
    %133 = vector.shape_cast %132 : vector<8xf32> to vector<8x1xf32>
    %cst_51 = arith.constant 3.200000e+01 : f32
    %134 = vector.broadcast %cst_51 : f32 to vector<8x1xf32>
    %135 = arith.divf %133, %134 : vector<8x1xf32>
    %136 = vector.broadcast %135 : vector<8x1xf32> to vector<8x32xf32>
    %137 = arith.subf %131, %136 : vector<8x32xf32>
    %138 = arith.mulf %137, %137 : vector<8x32xf32>
    %cst_52 = arith.constant dense<0.000000e+00> : vector<8xf32>
    %139 = vector.multi_reduction <add>, %138, %cst_52 [1] : vector<8x32xf32> to vector<8xf32>
    %140 = vector.shape_cast %139 : vector<8xf32> to vector<8x1xf32>
    %cst_53 = arith.constant 3.200000e+01 : f32
    %141 = vector.broadcast %cst_53 : f32 to vector<8x1xf32>
    %142 = arith.divf %140, %141 : vector<8x1xf32>
    %143 = vector.broadcast %135 : vector<8x1xf32> to vector<8x32xf32>
    %144 = arith.subf %131, %143 : vector<8x32xf32>
    %cst_54 = arith.constant 9.99999996E-13 : f32
    %145 = vector.broadcast %cst_54 : f32 to vector<8x1xf32>
    %146 = arith.addf %142, %145 : vector<8x1xf32>
    %147 = math.rsqrt %146 : vector<8x1xf32>
    %148 = vector.broadcast %147 : vector<8x1xf32> to vector<8x32xf32>
    %149 = arith.mulf %144, %148 : vector<8x32xf32>
    %150 = vector.broadcast %1 : vector<1x32xf32> to vector<8x32xf32>
    %151 = arith.mulf %149, %150 : vector<8x32xf32>
    %152 = vector.broadcast %2 : vector<1x32xf32> to vector<8x32xf32>
    %153 = arith.addf %151, %152 : vector<8x32xf32>
    %154 = arith.truncf %153 : vector<8x32xf32> to vector<8x32xbf16>
    %c0_55 = arith.constant 0 : index
    %c0_56 = arith.constant 0 : index
    %155 = vector.load %arg6[%c0_55, %c0_56] : memref<32x64xbf16, #tpu.memory_space<vmem>>, vector<32x64xbf16>
    %cst_57 = arith.constant dense<0.000000e+00> : vector<8x64xf32>
    %156 = tpu.matmul %154, %155, %cst_57 {dimension_numbers = #tpu.dot_dimension_numbers<[1], [0], [0], [1], [0, 0, 1, 1], [], []>} : vector<8x32xbf16>, vector<32x64xbf16>, vector<8x64xf32> -> vector<8x64xf32>
    %c0_58 = arith.constant 0 : index
    %c0_59 = arith.constant 0 : index
    %157 = vector.load %arg7[%c0_58, %c0_59] : memref<1x64xf32, #tpu.memory_space<vmem>>, vector<1x64xf32>
    %158 = vector.broadcast %157 : vector<1x64xf32> to vector<8x64xf32>
    %159 = arith.addf %156, %158 : vector<8x64xf32>
    %cst_60 = arith.constant 5.000000e-01 : f32
    %160 = vector.broadcast %cst_60 : f32 to vector<8x64xf32>
    %161 = arith.mulf %160, %159 : vector<8x64xf32>
    %cst_61 = arith.constant 0.707106769 : f32
    %162 = vector.broadcast %cst_61 : f32 to vector<8x64xf32>
    %163 = arith.mulf %159, %162 : vector<8x64xf32>
    %164 = math.erf %163 : vector<8x64xf32>
    %cst_62 = arith.constant 1.000000e+00 : f32
    %165 = vector.broadcast %cst_62 : f32 to vector<8x64xf32>
    %166 = arith.addf %165, %164 : vector<8x64xf32>
    %167 = arith.mulf %161, %166 : vector<8x64xf32>
    %168 = arith.truncf %167 : vector<8x64xf32> to vector<8x64xbf16>
    %c0_63 = arith.constant 0 : index
    %c0_64 = arith.constant 0 : index
    %169 = vector.load %arg8[%c0_63, %c0_64] : memref<64x32xbf16, #tpu.memory_space<vmem>>, vector<64x32xbf16>
    %cst_65 = arith.constant dense<0.000000e+00> : vector<8x32xf32>
    %170 = tpu.matmul %168, %169, %cst_65 {dimension_numbers = #tpu.dot_dimension_numbers<[1], [0], [0], [1], [0, 0, 1, 1], [], []>} : vector<8x64xbf16>, vector<64x32xbf16>, vector<8x32xf32> -> vector<8x32xf32>
    %171 = vector.broadcast %3 : vector<1x32xf32> to vector<8x32xf32>
    %172 = arith.addf %170, %171 : vector<8x32xf32>
    %173 = arith.addf %172, %153 : vector<8x32xf32>
    %cst_66 = arith.constant dense<0.000000e+00> : vector<8xf32>
    %174 = vector.multi_reduction <add>, %173, %cst_66 [1] : vector<8x32xf32> to vector<8xf32>
    %175 = vector.shape_cast %174 : vector<8xf32> to vector<8x1xf32>
    %cst_67 = arith.constant 3.200000e+01 : f32
    %176 = vector.broadcast %cst_67 : f32 to vector<8x1xf32>
    %177 = arith.divf %175, %176 : vector<8x1xf32>
    %178 = vector.broadcast %177 : vector<8x1xf32> to vector<8x32xf32>
    %179 = arith.subf %173, %178 : vector<8x32xf32>
    %180 = arith.mulf %179, %179 : vector<8x32xf32>
    %cst_68 = arith.constant dense<0.000000e+00> : vector<8xf32>
    %181 = vector.multi_reduction <add>, %180, %cst_68 [1] : vector<8x32xf32> to vector<8xf32>
    %182 = vector.shape_cast %181 : vector<8xf32> to vector<8x1xf32>
    %cst_69 = arith.constant 3.200000e+01 : f32
    %183 = vector.broadcast %cst_69 : f32 to vector<8x1xf32>
    %184 = arith.divf %182, %183 : vector<8x1xf32>
    %185 = vector.broadcast %177 : vector<8x1xf32> to vector<8x32xf32>
    %186 = arith.subf %173, %185 : vector<8x32xf32>
    %cst_70 = arith.constant 9.99999996E-13 : f32
    %187 = vector.broadcast %cst_70 : f32 to vector<8x1xf32>
    %188 = arith.addf %184, %187 : vector<8x1xf32>
    %189 = math.rsqrt %188 : vector<8x1xf32>
    %190 = vector.broadcast %189 : vector<8x1xf32> to vector<8x32xf32>
    %191 = arith.mulf %186, %190 : vector<8x32xf32>
    %192 = vector.broadcast %4 : vector<1x32xf32> to vector<8x32xf32>
    %193 = arith.mulf %191, %192 : vector<8x32xf32>
    %194 = vector.broadcast %5 : vector<1x32xf32> to vector<8x32xf32>
    %195 = arith.addf %193, %194 : vector<8x32xf32>
    %196 = vector.shape_cast %195 : vector<8x32xf32> to vector<1x8x32xf32>
    %c0_71 = arith.constant 0 : index
    %c0_72 = arith.constant 0 : index
    %c0_73 = arith.constant 0 : index
    %197 = vector.load %arg10[%c0_71, %c0_72, %c0_73] : memref<1x8x32xf32, #tpu.memory_space<vmem>>, vector<1x8x32xf32>
    tpu.vector_store %arg10[%c0_71, %c0_72, %c0_73], %196 {strides = array<i32>} : memref<1x8x32xf32, #tpu.memory_space<vmem>>, vector<1x8x32xf32>,
    return
  }
  func.func @transform_0(%arg0: i32) -> (i32, i32, i32) {
    %c0_i32 = arith.constant 0 : i32
    %c0_i32_0 = arith.constant 0 : i32
    %c0_i32_1 = arith.constant 0 : i32
    return %arg0, %c0_i32, %c0_i32_0 : i32, i32, i32
  }
  func.func @transform_1(%arg0: i32) -> (i32, i32, i32) {
    %c0_i32 = arith.constant 0 : i32
    %c0_i32_0 = arith.constant 0 : i32
    %c0_i32_1 = arith.constant 0 : i32
    return %arg0, %c0_i32, %c0_i32_0 : i32, i32, i32
  }
  func.func @transform_2(%arg0: i32) -> (i32, i32) {
    %c0_i32 = arith.constant 0 : i32
    %c0_i32_0 = arith.constant 0 : i32
    %c0_i32_1 = arith.constant 0 : i32
    return %c0_i32, %c0_i32_0 : i32, i32
  }
  func.func @transform_3(%arg0: i32) -> (i32, i32) {
    %c0_i32 = arith.constant 0 : i32
    %c0_i32_0 = arith.constant 0 : i32
    %c0_i32_1 = arith.constant 0 : i32
    return %c0_i32, %c0_i32_0 : i32, i32
  }
  func.func @transform_4(%arg0: i32) -> (i32, i32) {
    %c0_i32 = arith.constant 0 : i32
    %c0_i32_0 = arith.constant 0 : i32
    %c0_i32_1 = arith.constant 0 : i32
    return %c0_i32, %c0_i32_0 : i32, i32
  }
  func.func @transform_5(%arg0: i32) -> (i32, i32) {
    %c0_i32 = arith.constant 0 : i32
    %c0_i32_0 = arith.constant 0 : i32
    %c0_i32_1 = arith.constant 0 : i32
    return %c0_i32, %c0_i32_0 : i32, i32
  }
  func.func @transform_6(%arg0: i32) -> (i32, i32) {
    %c0_i32 = arith.constant 0 : i32
    %c0_i32_0 = arith.constant 0 : i32
    %c0_i32_1 = arith.constant 0 : i32
    return %c0_i32, %c0_i32_0 : i32, i32
  }
  func.func @transform_7(%arg0: i32) -> (i32, i32) {
    %c0_i32 = arith.constant 0 : i32
    %c0_i32_0 = arith.constant 0 : i32
    %c0_i32_1 = arith.constant 0 : i32
    return %c0_i32, %c0_i32_0 : i32, i32
  }
  func.func @transform_8(%arg0: i32) -> (i32, i32) {
    %c0_i32 = arith.constant 0 : i32
    %c0_i32_0 = arith.constant 0 : i32
    %c0_i32_1 = arith.constant 0 : i32
    return %c0_i32, %c0_i32_0 : i32, i32
  }
  func.func @transform_9(%arg0: i32) -> (i32, i32, i32) {
    %c0_i32 = arith.constant 0 : i32
    %c0_i32_0 = arith.constant 0 : i32
    %c0_i32_1 = arith.constant 0 : i32
    return %arg0, %c0_i32, %c0_i32_0 : i32, i32, i32
  }
}

</mosaic_0001>

<bundles_post_ra>
// kernel: tpu_custom_call.1
= control target key start
LH: loop header
LB: loop body
LE: loop exit
PB: predicated region body
PF: predicated region fallthrough
CT: control target
= control target key end

     0   :  { %s2229_s0 = inlined_call_operand.vmem [shape: f32[2,8,32], index: 0, kind: input, shape index: {}]   ;;  %s2230_s1 = inlined_call_operand.hbm [shape: f32[2,1,8], index: 1, kind: input, shape index: {}]   ;;  %s2231_s2 = inlined_call_operand.vmem [shape: bf16[32,96], index: 2, kind: input, shape index: {}]   ;;  %s2232_s3 = inlined_call_operand.vmem [shape: f32[1,96], index: 3, kind: input, shape index: {}]   ;;  %s2233_s4 = inlined_call_operand.vmem [shape: bf16[32,32], index: 4, kind: input, shape index: {}]   ;;  %s2234_s5 = inlined_call_operand.hbm [shape: bf16[32,64], index: 5, kind: input, shape index: {}]   ;;  %s2235_s6 = inlined_call_operand.vmem [shape: f32[1,64], index: 6, kind: input, shape index: {}]   ;;  %s2236_s7 = inlined_call_operand.vmem [shape: bf16[64,32], index: 7, kind: input, shape index: {}]   ;;  %s2237_s8 = inlined_call_operand.vmem [shape: f32[8,32], index: 8, kind: input, shape index: {}]   ;;  %s2238_s9 = inlined_call_operand.hbm [shape: f32[2,8,32], index: 9, kind: output, shape index: {}]  }
   0x1   :  { %2246 = sst [smem:[#allocation14_spill]] %s2234_s5 }
   0x2   :  { %14 = vsyncpa [#allocation3], 0 }
   0x3   :  { %16 = vsyncpa [#allocation3 + $0x1], 0 }
   0x4   :  { %17 = vsyncpa [#allocation6], 0 }
   0x5   :  { %18 = vsyncpa [#allocation4], 0 }
   0x6   :  { %20 = vsyncpa [#allocation4 + $0x1], 0  ;;  %s1891_s30 = smov 0   ;;  %s1893_s10 = smov 0  }
   0x7   :  { %s1895_s11 = smov 0   ;;  %s1897_s12 = smov 0  }
   0x8 LB: > { %s1912_s13 = sadd.s32 4294967295, %s1820_s12   ;;  %s1416_s14 = sadd.s32 4294967294, %s1820_s12   ;;  %s1820_s12 = sphi %s1897_s12, %s2266_s12   ;;  %s1816_s11 = sphi %s1895_s11, %s2270_s11   ;;  %s1812_s10 = sphi %s1893_s10, %s2269_s10   ;;  %s1808_s30 = sphi %s1891_s30, %s2268_s30  }
   0x9   : > { %p72_p0 = scmp.ne.s32.totalorder %s1812_s10, %s1808_s30  ;;  %p2242_p1 = scmp.eq.s32.totalorder %s1912_s13, 0 }
   0xa   : > { %p249_p3 = scmp.eq.s32.totalorder %s1416_s14, 1  ;;  %p1417_p5 = scmp.ge.s32.totalorder %s1820_s12, 1 }
   0xb   : > { %p1921_p4 = por %p2242_p1, %p72_p0  ;;  %p256_p7 = scmp.lt.s32.totalorder %s1820_s12, 3 }
   0xc   : > { %p1926_p6 = por %p249_p3, %p72_p0  ;;  %s1822_s18 = smov [#allocation5]  }
   0xd   : > { %s2247_s15 = scalar_select %p1921_p4, 1, 0 }
   0xe   : > { %s2248_s16 = scalar_select %p1926_p6, 1, 0 }
   0xf   : > { %p1931_p8 = pnand %p1417_p5, %p256_p7  ;;  %s277_s19 = sshll.u32 %s1822_s18, 4  ;;  %s278_s19 = int_to_ptr.vmem [resolvable:$true] %s277_s19 }
  0x10   : > { %2249 = sst [smem:[#allocation11_spill]] %s2248_s16  ;;  %s1945_s21 = sadd.s32 1, %s1820_s12  }
  0x11   : > { %s2250_s17 = scalar_select %p1931_p8, 1, 0 }
  0x12   : > { %p1603_p9 = pneg %p1931_p8  ;;  %2252 = sst [smem:[#allocation12_spill]] %s1945_s21 }
  0x13   : > { %s59_s22 = sadd.s32 1, %s1816_s11  ;;  %s56_s23 = ssub.s32 %s1820_s12, %s1945_s21 }
  0x14   : > { %p1940_p11 = pnand %p1603_p9, %p2242_p1  ;;  %s1709_s24 = scalar_lea.vmem %s278_s19, 256 }
  0x15   : > { %p1710_p13 = scmp.ne.s32.totalorder %s278_s19, %s1709_s24  ;;  %p1717_p5 = scmp.lt.s32.totalorder %s278_s19, %s278_s19 }
  0x16   : > { %p1700_p12 = pneg %p1940_p11  ;;  %p1718_p7 = scmp.lt.s32.totalorder %s1709_s24, %s1709_s24 }
  0x18   : > { %p1712_p0 = pnand %p1710_p13, %p1700_p12  ;;  %p1719_p10 = por %p1718_p7, %p1717_p5 }
  0x1a   : > { %p1713_p3 = pneg %p1712_p0 }
  0x1c   : > { %p1720_p2 = pnand %p1719_p10, %p1713_p3 }
  0x1e   : > { %1723 = shalt.err (!%p1720_p2)
}
  0x1f   : > { %s1823_s25 = smov 64   ;;  %s1824_s26 = smov 4  }
  0x20   : > { %s2253_s5 = sld [smem:[#allocation14_spill]]  ;;  %p57_p9 = scmp.eq.s32.totalorder %s56_s23, 0 }
  0x21   : > { %p66_p12 = scmp.ne.s32.totalorder %s1816_s11, %s1812_s10  ;;  %p67_p10 = scmp.eq.s32.totalorder %s1820_s12, 0 }
  0x22   : > { %p1616_p2 = scmp.lt.s32.totalorder %s1820_s12, 2  ;;  %p2255_p0 = scmp.eq.s32.totalorder %s1912_s13, 1 }
  0x23   : > { %s1962_s29 = scalar_select %p57_p9, %s1816_s11, %s59_s22  }
  0x24   : > { %p68_p13 = por %p67_p10, %p66_p12  ;;  %p1966_p3 = por %p2255_p0, %p66_p12 }
  0x25   : > { %2254 = sst [smem:[#allocation13_spill]] %s1962_s29  ;;  %s307_s18 = sand.u32 1, %s1816_s11  }
  0x26   : > { %1606 = dma.hbm_to_vmem [thread:$0]  (!%p1940_p11), %s2253_s5, 256, %s278_s19, [#allocation6], %s1823_s25, %s1823_s25, %s1824_s26  }
  0x27   : > { %s2256_s14 = scalar_select %p1966_p3, 1, 0 }
  0x28   : > { %s1420_s24 = sshll.u32 %s1820_s12, 4  ;;  %s310_s19 = scalar_lea.vmem [#allocation2], %s307_s18 }
  0x29   : > { %s1975_s16 = scalar_lea.hbm %s2230_s1, %s1420_s24  ;;  %s317_s23 = sshll.u32 %s310_s19, 4  ;;  %s318_s23 = int_to_ptr.vmem [resolvable:$true] %s317_s23 }
  0x2a   : > { %p1977_p11 = pnand %p1616_p2, %p68_p13  ;;  %s308_s25 = scalar_lea.sflag [#allocation3], %s307_s18 }
  0x2b   : > { %s1724_s26 = scalar_lea.hbm %s1975_s16, 16  ;;  %s1729_s28 = scalar_lea.hbm %s2230_s1, 32 }
  0x2c   : > { %p1725_p5 = scmp.ne.s32.totalorder %s1975_s16, %s1724_s26  ;;  %p1726_p7 = pneg %p1977_p11 }
  0x2d   : > { %p1730_p10 = scmp.lt.s32.totalorder %s1975_s16, %s2230_s1  ;;  %p1731_p2 = scmp.lt.s32.totalorder %s1729_s28, %s1724_s26 }
  0x2e   : > { %p1727_p9 = pnand %p1726_p7, %p1725_p5 }
  0x2f   : > { %p1732_p13 = por %p1731_p2, %p1730_p10 }
  0x30   : > { %p1728_p12 = pneg %p1727_p9 }
  0x32   : > { %p1733_p0 = pnand %p1732_p13, %p1728_p12 }
  0x34   : > { %1736 = shalt.err (!%p1733_p0)
}
  0x35   : > { %s1737_s19 = scalar_lea.vmem %s318_s23, 16  ;;  %s1825_s18 = smov [#allocation2]  }
  0x36   : > { %p1738_p1 = scmp.ne.s32.totalorder %s318_s23, %s1737_s19  ;;  %s1742_s5 = sshll.u32 %s1825_s18, 4  ;;  %s1743_s5 = int_to_ptr.vmem [resolvable:$false] %s1742_s5 }
  0x37   : > { %s1744_s29 = scalar_lea.vmem %s1743_s5, 32  ;;  %p1745_p5 = scmp.lt.s32.totalorder %s318_s23, %s1743_s5 }
  0x38   : > { %p1740_p6 = pnand %p1738_p1, %p1726_p7  ;;  %p1746_p9 = scmp.lt.s32.totalorder %s1744_s29, %s1737_s19 }
  0x3a   : > { %p1741_p3 = pneg %p1740_p6  ;;  %p1747_p4 = por %p1746_p9, %p1745_p5 }
  0x3c   : > { %p1748_p8 = pnand %p1747_p4, %p1741_p3 }
  0x3e   : > { %1751 = shalt.err (!%p1748_p8)
}
  0x3f   : > { %1610 = dma.hbm_to_vmem [thread:$0]  (!%p1977_p11), %s1975_s16, 16, %s318_s23, %s308_s25  }
  0x40   : > { %p2258_p12 = scmp.ne.s32.totalorder %s2250_s17, 0 }
  0x41   : > { %s1998_s26 = sand.u32 (!%p2258_p12), 1, %s1812_s10   ;;  %p2259_p1 = scmp.ne.s32.totalorder (!%p2258_p12), %s2247_s15, 0 }
  0x42   : > { %326 = sbr.rel (%p2258_p12) target bundleno = 3126 (0xc36), region = 56  ;;  %s329_s21 = scalar_lea.sflag (!%p2258_p12), [#allocation3], %s1998_s26 }
  0x43   : > { %s331_s27 = scalar_lea.vmem (!%p2258_p12), [#allocation2], %s1998_s26 }
  0x47   : > { %1795 = dma.done.wait (%p2259_p1), %s329_s21, 16  }
  0x48   : > { %1797 = vsyncadd (%p2259_p1), %s329_s21, 4294967280  ;;  %p2260_p4 = scmp.eq.s32.totalorder %s1912_s13, 0 }
  0x4a   : > { %1799 = dma.done.wait (%p2260_p4), [#allocation6], 256   ;;  %p2261_p6 = pmov %p2260_p4 }
  0x4b   : > { %p373_p8 = scmp.lt.s32.totalorder %s1912_s13, 1  ;;  %v1826_v0 = vmov 0.0   ;;  %vm1827_vm0 = vmmov 0   ;;  %v1668_v1 = vld [vmem:[%s2231_s2 + $0x8] sm:$0xff]   ;;  %v1669_v2 = vld [vmem:[%s2231_s2] sm:$0xff]   ;;  %vm409_vm1 = vcmask 261120   ;;  %v507_v17 = vlaneseq }
  0x4c   : > { %1801 = vsyncadd (%p2261_p6), [#allocation6], 4294967040  ;;  %1495 = vmatprep.subr.bf16.mxu1 %v1826_v0  ;;  %1499 = vmatprep.mubr.msk.bf16.mxu1 %vm1827_vm0, %v1826_v0  ;;  %v1425_v5 = vld [vmem:[%s2232_s3] ss:$0 sm:$0xff]  ;;  %s1828_s19 = smov 120   ;;  %s1829_s18 = smov 96  }
  0x4d   : > { %s374_s5 = scalar_select %p373_p8, %s1912_s13, 1  ;;  %1509 = vmatprep.subr.bf16.mxu0 %v1826_v0  ;;  %1511 = vmatprep.mubr.msk.bf16.mxu0 %vm1827_vm0, %v1826_v0  ;;  %vm459_vm2 = vcmask 64512   ;;  %v454_v18 = vld [vmem:[%s331_s27] sm:$0x1]  ;;  %v508_v19 = vshrl.u32 %v507_v17, 7  ;;  %v1831_v21 = vmov 0  }
  0x4e   : > { %1496 = vmatpush3.bf16.msra.mxu1 %v1668_v1  ;;  %s1830_s21 = smov 88   ;;  %vm455_vm3 = vcmp.eq.f32.partialorder %v454_v18, 0.0  ;;  %s1832_s27 = smov 56   ;;  %vm528_vm5 = vcmask 1043456   ;;  %v576_v52 = vld [vmem:[%s2233_s4] sm:$0xf] }
  0x4f   : > { %s1424_s15 = sshll.u32 %s374_s5, 3  ;;  %1497 = vmatprep.subr.bf16.mxu1 %v1826_v0  ;;  %v509_v20 = vsub.s32 0, %v508_v19  ;;  %v506_v22 = vsel %vm455_vm3, 1, %v1831_v21  ;;  %s1833_s5 = smov 64   ;;  %v741_v53 = vsel %vm528_vm5, %v576_v52, 0  ;;  %vm1244_vm6 = vcmask 523264  }
  0x50   : > { %s376_s29 = scalar_lea.vmem %s2229_s0, %s1424_s15  ;;  %s1834_s15 = smov 80   ;;  %v690_v54 = vld [vmem:[%s2233_s4 + $0x4] sm:$0xf] }
  0x51   : > { %v2027_v3 = vld [vmem:[%s376_s29] sm:$0xff]  ;;  %v2057_v23 = vrot.slane %v506_v22, %v509_v20  ;;  %s1835_s16 = smov 112   ;;  %s1836_s17 = smov 72   ;;  %v695_v55 = vsel %vm528_vm5, %v690_v54, 0 }
  0x52   : > { %v385_v4 = vpack.c.bf16 %v2027_v3, %v2027_v3  ;;  %1498 = vmatpush3.bf16.msra.mxu1 %v1669_v2  ;;  %s1837_s28 = smov 48   ;;  %s1838_s24 = smov 104  }
  0x53   : > { %1503 = vmatprep.subr.bf16.mxu1 %v1826_v0  ;;  %vm511_vm4 = vcmp.eq.s32.totalorder %v2057_v23, 1  ;;  %p2262_p11 = scmp.ne.s32.totalorder %s2256_s14, 0 }
  0x55   : > { %1500 = vmatmul.mubr.msk.bf16.vlgmr.msra.gmra.mxu1 %vm409_vm1, %v385_v4 }
  0x56   : > { %1505 = vmatprep.mubr.msk.bf16.mxu1 %vm1827_vm0, %v1826_v0 }
 0x115   : > { %v447_v6 = vpop.f32.mrf.mxu1 }
 0x116   : > { %v448_v7 = vadd.f32 %v1425_v5, %v447_v6 }
 0x117   : > { %v1501_v8 = vpop.f32.mrf.mxu1 }
 0x118   : > { %v2039_v9 = vpack.c.bf16 %v448_v7, %v448_v7 }
 0x119   : > { %v450_v10 = vpop.f32.mrf.mxu1 }
 0x11a   : > { %577 = vrot.lane.b32.xlu1 %v2039_v9, %s1828_s19  ;;  %457 = vrot.lane.b32.xlu0 %v2039_v9, %s1829_s18  ;;  %s1839_s18 = smov 40  }
 0x11b   : > { %v1502_v11 = vpop.f32.mrf.mxu1 }
 0x11e   : > { %579 = vrot.lane.b32.xlu0 %v2039_v9, %s1830_s21 }
 0x18c   : > { %v458_v12 = vpop.permute.xlu0 %457  ;;  %v578_v16 = vpop.permute.xlu1 %577 }
 0x18d   : > { %v464_v13 = vsel %vm459_vm2, %v458_v12, 0 }
 0x18e   : > { %1504 = vmatpush3.bf16.xpose.msra.mxu1 %v464_v13 }
 0x18f   : > { %1515 = vmatprep.subr.bf16.mxu1 %v1826_v0 }
 0x190   : > { %v580_v14 = vpop.permute.xlu0 %579 }
 0x191   : > { %v585_v15 = vsel %vm459_vm2, %v580_v14, 0 }
 0x195   : > { %1506 = vmatmul.mubr.msk.bf16.vlgmr.msra.gmra.mxu1 %vm459_vm2, %v2039_v9 }
 0x196   : > { %1516 = vmatpush3.bf16.xpose.msra.mxu1 %v585_v15  ;;  %1517 = vmatprep.mubr.msk.bf16.mxu1 %vm1827_vm0, %v1826_v0 }
 0x197   : > { %1527 = vmatprep.subr.bf16.mxu1 %v1826_v0 }
 0x19d   : > { %1518 = vmatmul.mubr.msk.bf16.vlgmr.msra.gmra.mxu1 %vm459_vm2, %v578_v16 }
 0x19e   : > { %1529 = vmatprep.mubr.msk.bf16.mxu1 %vm1827_vm0, %v1826_v0  ;;  %1528 = vmatpush3.bf16.msra.mxu1 %v695_v55 }
 0x19f   : > { %1539 = vmatprep.subr.bf16.mxu1 %v1826_v0 }
 0x255   : > { %v500_v24 = vpop.f32.mrf.mxu1 }
 0x256   : > { %v512_v25 = vsel %vm511_vm4, -1e+30, %v500_v24 }
 0x257   : > { %v1507_v26 = vpop.f32.mrf.mxu1  ;;  %v513_v27 = vsel %vm459_vm2, %v512_v25, -inf }
 0x258   : > { %514 = vmax.xlane.f32.xlu1 %v513_v27 }
 0x259   : > { %v503_v28 = vpop.f32.mrf.mxu1 }
 0x25b   : > { %v1508_v29 = vpop.f32.mrf.mxu1 }
 0x25d   : > { %v621_v30 = vpop.f32.mrf.mxu1 }
 0x25e   : > { %v627_v31 = vsel %vm511_vm4, -1e+30, %v621_v30 }
 0x25f   : > { %v1519_v32 = vpop.f32.mrf.mxu1  ;;  %v628_v33 = vsel %vm459_vm2, %v627_v31, -inf }
 0x260   : > { %629 = vmax.xlane.f32.xlu0 %v628_v33 }
 0x261   : > { %v624_v34 = vpop.f32.mrf.mxu1 }
 0x263   : > { %v1520_v35 = vpop.f32.mrf.mxu1 }
 0x269   : > { %638 = vrot.lane.b32.xlu1 %v2039_v9, %s1832_s27  ;;  %s1314_s27 = scalar_lea.sflag [#allocation4], %s1998_s26 }
 0x276   : > { %523 = vrot.lane.b32.xlu0 %v2039_v9, %s1833_s5 }
 0x27a   : > { %785 = vrot.lane.b32.xlu0 %v2039_v9, %s1834_s15  ;;  %s1840_s15 = smov [#allocation7]  }
 0x27e   : > { %783 = vrot.lane.b32.xlu0 %v2039_v9, %s1835_s16  ;;  %s1756_s16 = sshll.u32 %s1840_s15, 4  ;;  %s1757_s16 = int_to_ptr.vmem [resolvable:$false] %s1756_s16 }
 0x2e1   : > { %v515_v36 = vpop.xlane.xlu1 %514 }
 0x2e2   : > { %v516_v37 = vsub.f32 %v512_v25, %v515_v36 }
 0x2e4   : > { %v517_v38 = vmul.f32 1.442695, %v516_v37 }
 0x2e5   : > { %v639_v45 = vpop.permute.xlu1 %638 }
 0x2e6   : > { %1676 = vpow2.f32 %v517_v38  ;;  %v644_v48 = vsel %vm528_vm5, %v639_v45, 0 }
 0x2e9   : > { %v630_v39 = vpop.xlane.xlu0 %629 }
 0x2ea   : > { %v631_v40 = vsub.f32 %v627_v31, %v630_v39 }
 0x2ec   : > { %v632_v41 = vmul.f32 1.442695, %v631_v40 }
 0x2ed   : > { %v524_v42 = vpop.permute.xlu0 %523 }
 0x2ee   : > { %1678 = vpow2.f32 %v632_v41  ;;  %v530_v43 = vsel %vm528_vm5, %v524_v42, 0  ;;  %v896_v41 = vld [vmem:[%s2233_s4 + $0x8] sm:$0xf] }
 0x2ef   : > { %1510 = vmatpush3.bf16.msra.mxu0 %v530_v43  ;;  %v901_v42 = vsel %vm528_vm5, %v896_v41, 0 }
 0x2f0   : > { %1521 = vmatprep.subr.bf16.mxu0 %v1826_v0 }
 0x2f1   : > { %v786_v56 = vpop.permute.xlu0 %785 }
 0x2f2   : > { %v791_v12 = vsel %vm459_vm2, %v786_v56, 0 }
 0x2f3   : > { %v1677_v44 = vpop.eup %1676 }
 0x2f4   : > { %v519_v46 = vsel %vm459_vm2, %v1677_v44, 0.0  ;;  %v522_v47 = vpack.c.bf16 %v1677_v44, %v1677_v44 }
 0x2f5   : > { %520 = vadd.xlane.f32.xlu0 %v519_v46  ;;  %v784_v57 = vpop.permute.xlu0 %783 }
 0x2f6   : > { %1512 = vmatmul.mubr.msk.bf16.vlgmr.msra.gmra.mxu0 %vm459_vm2, %v522_v47 }
 0x2f7   : > { %1522 = vmatpush3.bf16.msra.mxu0 %v644_v48  ;;  %1523 = vmatprep.mubr.msk.bf16.mxu0 %vm1827_vm0, %v1826_v0 }
 0x2f8   : > { %1533 = vmatprep.subr.bf16.mxu0 %v1826_v0 }
 0x2fb   : > { %v1679_v49 = vpop.eup %1678 }
 0x2fc   : > { %v634_v50 = vsel %vm459_vm2, %v1679_v49, 0.0  ;;  %v637_v51 = vpack.c.bf16 %v1679_v49, %v1679_v49 }
 0x2fd   : > { %635 = vadd.xlane.f32.xlu1 %v634_v50 }
 0x2fe   : > { %1524 = vmatmul.mubr.msk.bf16.vlgmr.msra.gmra.mxu0 %vm459_vm2, %v637_v51 }
 0x2ff   : > { %1535 = vmatprep.mubr.msk.bf16.mxu0 %vm1827_vm0, %v1826_v0  ;;  %1534 = vmatpush3.bf16.msra.mxu0 %v741_v53 }
 0x300   : > { %1545 = vmatprep.subr.bf16.mxu0 %v1826_v0 }
 0x30b   : > { %946 = vrot.lane.b32.xlu0 %v2039_v9, %s1836_s17  ;;  %s1423_s17 = sshll.u32 %s1998_s26, 3 }
 0x37e   : > { %v521_v58 = vpop.xlane.xlu0 %520 }
 0x37f   : > { %1680 = vrcp.f32 %v521_v58 }
 0x382   : > { %v947_v36 = vpop.permute.xlu0 %946 }
 0x383   : > { %v952_v39 = vsel %vm459_vm2, %v947_v36, 0 }
 0x386   : > { %v636_v59 = vpop.xlane.xlu1 %635 }
 0x387   : > { %1682 = vrcp.f32 %v636_v59 }
 0x38c   : > { %v1681_v60 = vpop.eup %1680 }
 0x394   : > { %v1683_v5 = vpop.eup %1682 }
 0x3b6   : > { %v566_v61 = vpop.f32.mrf.mxu0 }
 0x3b7   : > { %v574_v62 = vmul.f32 %v1681_v60, %v566_v61 }
 0x3b8   : > { %v1513_v63 = vpop.f32.mrf.mxu0 }
 0x3b9   : > { %v575_v1 = vpack.c.bf16 %v574_v62, %v574_v62 }
 0x3ba   : > { %v569_v2 = vpop.f32.mrf.mxu0 }
 0x3bb   : > { %1536 = vmatmul.mubr.msk.bf16.vlgmr.msra.gmra.mxu0 %vm459_vm2, %v575_v1 }
 0x3bc   : > { %v1514_v4 = vpop.f32.mrf.mxu0  ;;  %1547 = vmatprep.mubr.msk.bf16.mxu0 %vm1827_vm0, %v1826_v0 }
 0x3be   : > { %v680_v6 = vpop.f32.mrf.mxu0 }
 0x3bf   : > { %v688_v7 = vmul.f32 %v1683_v5, %v680_v6 }
 0x3c0   : > { %v1525_v8 = vpop.f32.mrf.mxu0 }
 0x3c1   : > { %v689_v10 = vpack.c.bf16 %v688_v7, %v688_v7 }
 0x3c2   : > { %v683_v11 = vpop.f32.mrf.mxu0 }
 0x3c3   : > { %1530 = vmatmul.mubr.msk.bf16.vlgmr.msra.gmra.mxu1 %vm459_vm2, %v689_v10 }
 0x3c4   : > { %1540 = vmatpush3.bf16.xpose.msra.mxu1 %v791_v12  ;;  %v1526_v13 = vpop.f32.mrf.mxu0  ;;  %1541 = vmatprep.mubr.msk.bf16.mxu1 %vm1827_vm0, %v1826_v0 }
 0x3c5   : > { %1551 = vmatprep.subr.bf16.mxu1 %v1826_v0 }
 0x3cb   : > { %1542 = vmatmul.mubr.msk.bf16.vlgmr.msra.gmra.mxu1 %vm459_vm2, %v784_v57 }
 0x3cc   : > { %1553 = vmatprep.mubr.msk.bf16.mxu1 %vm1827_vm0, %v1826_v0  ;;  %1552 = vmatpush3.bf16.msra.mxu1 %v901_v42 }
 0x3cd   : > { %1563 = vmatprep.subr.bf16.mxu1 %v1826_v0 }
 0x47b   : > { %v777_v14 = vpop.f32.mrf.mxu0 }
 0x47d   : > { %v1537_v15 = vpop.f32.mrf.mxu0 }
 0x47f   : > { %v780_v16 = vpop.f32.mrf.mxu0 }
 0x481   : > { %v1538_v17 = vpop.f32.mrf.mxu0 }
 0x482   : > { %v1441_v17 = vld [vmem:[%s2237_s8] ss:$0 sm:$0xff] }
 0x483   : > { %v731_v18 = vpop.f32.mrf.mxu1 }
 0x484   : > { %v2104_v19 = vadd.f32 %v777_v14, %v731_v18 }
 0x485   : > { %v1531_v20 = vpop.f32.mrf.mxu1 }
 0x487   : > { %v734_v21 = vpop.f32.mrf.mxu1 }
 0x489   : > { %v1532_v22 = vpop.f32.mrf.mxu1 }
 0x48b   : > { %v827_v24 = vpop.f32.mrf.mxu1 }
 0x48c   : > { %v833_v25 = vsel %vm511_vm4, -1e+30, %v827_v24 }
 0x48d   : > { %v1543_v26 = vpop.f32.mrf.mxu1  ;;  %v834_v27 = vsel %vm459_vm2, %v833_v25, -inf }
 0x48e   : > { %835 = vmax.xlane.f32.xlu1 %v834_v27 }
 0x48f   : > { %v830_v28 = vpop.f32.mrf.mxu1 }
 0x491   : > { %v1544_v29 = vpop.f32.mrf.mxu1 }
 0x49f   : > { %844 = vrot.lane.b32.xlu1 %v2039_v9, %s1837_s28  ;;  %s1457_s28 = sshll.u32 %s1912_s13, 7  ;;  %s1758_s13 = scalar_lea.vmem %s1757_s16, 256 }
 0x4a0   : > { %s1325_s21 = scalar_lea.hbm %s2238_s9, %s1457_s28 }
 0x4a3   : > { %944 = vrot.lane.b32.xlu1 %v2039_v9, %s1838_s24  ;;  %s372_s24 = scalar_lea.vmem [#allocation7], %s1423_s17 }
 0x4a4   : > { %s1327_s20 = sshll.u32 %s372_s24, 4  ;;  %s1328_s20 = int_to_ptr.vmem [resolvable:$true] %s1327_s20 }
 0x4a5   : > { %s1752_s5 = scalar_lea.vmem %s1328_s20, 128  ;;  %p1759_p2 = scmp.lt.s32.totalorder %s1328_s20, %s1757_s16 }
 0x4a6   : > { %p1753_p3 = scmp.ne.s32.totalorder %s1328_s20, %s1752_s5  ;;  %p1760_p13 = scmp.lt.s32.totalorder %s1758_s13, %s1752_s5 }
 0x4a8   : > { %p1754_p7 = pnand %p1753_p3, %p2262_p11  ;;  %p1761_p0 = por %p1760_p13, %p1759_p2 }
 0x4aa   : > { %p1755_p10 = pneg %p1754_p7 }
 0x4ac   : > { %p1762_p5 = pnand %p1761_p0, %p1755_p10 }
 0x517   : > { %v836_v30 = vpop.xlane.xlu1 %835 }
 0x518   : > { %v837_v31 = vsub.f32 %v833_v25, %v836_v30 }
 0x51a   : > { %v838_v32 = vmul.f32 1.442695, %v837_v31 }
 0x51b   : > { %v845_v33 = vpop.permute.xlu1 %844 }
 0x51c   : > { %1684 = vpow2.f32 %v838_v32  ;;  %v850_v34 = vsel %vm528_vm5, %v845_v33, 0  ;;  %v1670_v32 = vld [vmem:[#allocation5 + $0x8] sm:$0xff]   ;;  %v1671_v33 = vld [vmem:[#allocation5] sm:$0xff]  }
 0x51d   : > { %1546 = vmatpush3.bf16.msra.mxu0 %v850_v34 }
 0x51e   : > { %1557 = vmatprep.subr.bf16.mxu0 %v1826_v0 }
 0x51f   : > { %v945_v40 = vpop.permute.xlu1 %944 }
 0x529   : > { %v1685_v35 = vpop.eup %1684 }
 0x52a   : > { %v840_v37 = vsel %vm459_vm2, %v1685_v35, 0.0  ;;  %v843_v38 = vpack.c.bf16 %v1685_v35, %v1685_v35 }
 0x52b   : > { %841 = vadd.xlane.f32.xlu1 %v840_v37  ;;  %v1442_v37 = vld [vmem:[%s2237_s8 + $0x1] ss:$0 sm:$0xff] }
 0x52c   : > { %1548 = vmatmul.mubr.msk.bf16.vlgmr.msra.gmra.mxu0 %vm459_vm2, %v843_v38 }
 0x52d   : > { %1558 = vmatpush3.bf16.xpose.msra.mxu0 %v952_v39  ;;  %1559 = vmatprep.mubr.msk.bf16.mxu0 %vm1827_vm0, %v1826_v0  ;;  %v1443_v39 = vld [vmem:[%s2237_s8 + $0x2] ss:$0 sm:$0xff] }
 0x52e   : > { %1569 = vmatprep.subr.bf16.mxu0 %v1826_v0 }
 0x534   : > { %1560 = vmatmul.mubr.msk.bf16.vlgmr.msra.gmra.mxu0 %vm459_vm2, %v945_v40 }
 0x535   : > { %1571 = vmatprep.mubr.msk.bf16.mxu0 %vm1827_vm0, %v1826_v0 }
 0x5b4   : > { %v842_v43 = vpop.xlane.xlu1 %841 }
 0x5b5   : > { %1686 = vrcp.f32 %v842_v43  ;;  %v1672_v43 = vld [vmem:[%s2236_s7 + $0x18] sm:$0xff]  }
 0x5c2   : > { %v1687_v44 = vpop.eup %1686 }
 0x5ec   : > { %v886_v45 = vpop.f32.mrf.mxu0 }
 0x5ed   : > { %v894_v46 = vmul.f32 %v1687_v44, %v886_v45  ;;  %v1673_v44 = vld [vmem:[%s2236_s7 + $0x10] sm:$0xff]   ;;  %v1674_v45 = vld [vmem:[%s2236_s7 + $0x8] sm:$0xff]  }
 0x5ee   : > { %v1549_v47 = vpop.f32.mrf.mxu0 }
 0x5ef   : > { %v895_v48 = vpack.c.bf16 %v894_v46, %v894_v46  ;;  %v1675_v46 = vld [vmem:[%s2236_s7] sm:$0xff]  }
 0x5f0   : > { %v889_v49 = vpop.f32.mrf.mxu0  ;;  %v1444_v47 = vld [vmem:[%s2235_s6] ss:$0 sm:$0xff] }
 0x5f1   : > { %1554 = vmatmul.mubr.msk.bf16.vlgmr.msra.gmra.mxu1 %vm459_vm2, %v895_v48 }
 0x5f2   : > { %v1550_v50 = vpop.f32.mrf.mxu0  ;;  %1565 = vmatprep.mubr.msk.bf16.mxu1 %vm1827_vm0, %v1826_v0 }
 0x5f4   : > { %v988_v51 = vpop.f32.mrf.mxu0 }
 0x5f5   : > { %v994_v52 = vsel %vm511_vm4, -1e+30, %v988_v51 }
 0x5f6   : > { %v1561_v53 = vpop.f32.mrf.mxu0  ;;  %v995_v54 = vsel %vm459_vm2, %v994_v52, -inf }
 0x5f7   : > { %996 = vmax.xlane.f32.xlu0 %v995_v54 }
 0x5f8   : > { %v991_v55 = vpop.f32.mrf.mxu0 }
 0x5fa   : > { %v1562_v56 = vpop.f32.mrf.mxu0 }
 0x60d   : > { %1005 = vrot.lane.b32.xlu0 %v2039_v9, %s1839_s18  ;;  %v1057_v9 = vld [vmem:[%s2233_s4 + $0xc] sm:$0xf] }
 0x60e   : > { %v1062_v1 = vsel %vm528_vm5, %v1057_v9, 0 }
 0x60f   : > { %1570 = vmatpush3.bf16.msra.mxu0 %v1062_v1 }
 0x610   : > { %1583 = vmatprep.subr.bf16.mxu0 %v1826_v0 }
 0x680   : > { %v997_v57 = vpop.xlane.xlu0 %996 }
 0x681   : > { %v998_v58 = vsub.f32 %v994_v52, %v997_v57 }
 0x683   : > { %v999_v59 = vmul.f32 1.442695, %v998_v58  ;;  %v1448_v58 = vld [vmem:[%s2237_s8 + $0x3] ss:$0 sm:$0xff] }
 0x684   : > { %v1006_v60 = vpop.permute.xlu0 %1005 }
 0x685   : > { %1688 = vpow2.f32 %v999_v59  ;;  %v1011_v61 = vsel %vm528_vm5, %v1006_v60, 0 }
 0x686   : > { %1564 = vmatpush3.bf16.msra.mxu1 %v1011_v61 }
 0x687   : > { %1575 = vmatprep.subr.bf16.mxu1 %v1826_v0 }
 0x692   : > { %v1689_v23 = vpop.eup %1688 }
 0x693   : > { %v1001_v62 = vsel %vm459_vm2, %v1689_v23, 0.0  ;;  %v1004_v63 = vpack.c.bf16 %v1689_v23, %v1689_v23 }
 0x694   : > { %1002 = vadd.xlane.f32.xlu1 %v1001_v62 }
 0x695   : > { %1566 = vmatmul.mubr.msk.bf16.vlgmr.msra.gmra.mxu1 %vm459_vm2, %v1004_v63 }
 0x696   : > { %1579 = vmatprep.mubr.msk.bf16.mxu1 %vm1827_vm0, %v1826_v0  ;;  %1576 = vmatpush3.bf16.msra.mxu1 %v1670_v32 }
 0x697   : > { %1577 = vmatprep.subr.bf16.mxu1 %v1826_v0 }
 0x69a   : > { %1578 = vmatpush3.bf16.msra.mxu1 %v1671_v33 }
 0x6b1   : > { %v937_v2 = vpop.f32.mrf.mxu1 }
 0x6b2   : > { %v943_v4 = vadd.f32 %v937_v2, %v2104_v19 }
 0x6b3   : > { %v1555_v5 = vpop.f32.mrf.mxu1 }
 0x6b5   : > { %v940_v6 = vpop.f32.mrf.mxu1 }
 0x6b7   : > { %v1556_v7 = vpop.f32.mrf.mxu1 }
 0x71d   : > { %v1003_v8 = vpop.xlane.xlu1 %1002 }
 0x71e   : > { %1690 = vrcp.f32 %v1003_v8 }
 0x72b   : > { %v1691_v10 = vpop.eup %1690 }
 0x755   : > { %v1047_v11 = vpop.f32.mrf.mxu1 }
 0x756   : > { %v1055_v12 = vmul.f32 %v1691_v10, %v1047_v11 }
 0x757   : > { %v1567_v13 = vpop.f32.mrf.mxu1 }
 0x758   : > { %v1056_v14 = vpack.c.bf16 %v1055_v12, %v1055_v12  ;;  %v1454_v12 = vld [vmem:[%s2237_s8 + $0x4] ss:$0 sm:$0xff] }
 0x759   : > { %v1050_v15 = vpop.f32.mrf.mxu1 }
 0x75a   : > { %1572 = vmatmul.mubr.msk.bf16.vlgmr.msra.gmra.mxu0 %vm459_vm2, %v1056_v14  ;;  %v1455_v14 = vld [vmem:[%s2237_s8 + $0x5] ss:$0 sm:$0xff] }
 0x75b   : > { %v1568_v16 = vpop.f32.mrf.mxu1  ;;  %1591 = vmatprep.mubr.msk.bf16.mxu0 %vm1827_vm0, %v1826_v0  ;;  %1584 = vmatpush3.bf16.msra.mxu0 %v1672_v43 }
 0x75c   : > { %1585 = vmatprep.subr.bf16.mxu0 %v1826_v0 }
 0x75f   : > { %1586 = vmatpush3.bf16.msra.mxu0 %v1673_v44 }
 0x760   : > { %1587 = vmatprep.subr.bf16.mxu0 %v1826_v0 }
 0x763   : > { %1588 = vmatpush3.bf16.msra.mxu0 %v1674_v45 }
 0x764   : > { %1589 = vmatprep.subr.bf16.mxu0 %v1826_v0 }
 0x767   : > { %1590 = vmatpush3.bf16.msra.mxu0 %v1675_v46 }
 0x81a   : > { %v1098_v18 = vpop.f32.mrf.mxu0 }
 0x81b   : > { %v1104_v19 = vadd.f32 %v1098_v18, %v943_v4 }
 0x81c   : > { %v1573_v20 = vpop.f32.mrf.mxu0 }
 0x81d   : > { %v1109_v21 = vadd.f32 %v1441_v17, %v1104_v19 }
 0x81e   : > { %v1101_v22 = vpop.f32.mrf.mxu0 }
 0x81f   : > { %v1110_v24 = vadd.f32 %v1109_v21, %v2027_v3 }
 0x820   : > { %v1574_v25 = vpop.f32.mrf.mxu0 }
 0x821   : > { %v1111_v26 = vsel %vm409_vm1, %v1110_v24, 0.0 }
 0x822   : > { %1112 = vadd.xlane.f32.xlu1 %v1111_v26 }
 0x8ab   : > { %v1113_v27 = vpop.xlane.xlu1 %1112 }
 0x8ac   : > { %v1115_v28 = vmul.f32 0.03125, %v1113_v27 }
 0x8ae   : > { %v1116_v29 = vsub.f32 %v1110_v24, %v1115_v28 }
 0x8b0   : > { %v1117_v30 = vmul.f32 %v1116_v29, %v1116_v29 }
 0x8b2   : > { %v1118_v31 = vsel %vm409_vm1, %v1117_v30, 0.0 }
 0x8b3   : > { %1119 = vadd.xlane.f32.xlu1 %v1118_v31 }
 0x93c   : > { %v1120_v34 = vpop.xlane.xlu1 %1119 }
 0x93d   : > { %v1121_v35 = vmul.f32 0.03125, %v1120_v34 }
 0x93f   : > { %v1122_v3 = vadd.f32 1e-12, %v1121_v35 }
 0x941   : > { %1692 = vrsqrt.f32 %v1122_v3 }
 0x94e   : > { %v1693_v36 = vpop.eup %1692 }
 0x94f   : > { %v1124_v38 = vmul.f32 %v1693_v36, %v1116_v29 }
 0x951   : > { %v1129_v40 = vmul.f32 %v1442_v37, %v1124_v38 }
 0x953   : > { %v1134_v41 = vadd.f32 %v1443_v39, %v1129_v40 }
 0x955   : > { %v1135_v42 = vpack.c.bf16 %v1134_v41, %v1134_v41 }
 0x957   : > { %1580 = vmatmul.mubr.msk.bf16.vlgmr.msra.gmra.mxu1 %vm409_vm1, %v1135_v42 }
 0xa17   : > { %v1196_v48 = vpop.f32.mrf.mxu1 }
 0xa18   : > { %v1197_v49 = vadd.f32 %v1444_v47, %v1196_v48 }
 0xa19   : > { %v1581_v50 = vpop.f32.mrf.mxu1 }
 0xa1a   : > { %v1203_v51 = vmul.f32 0.70710677, %v1197_v49  ;;  %v1202_v55 = vmul.f32 0.5, %v1197_v49 }
 0xa1b   : > { %v1199_v52 = vpop.f32.mrf.mxu1 }
 0xa1c   : > { %1694 = verf.f32 %v1203_v51 }
 0xa1d   : > { %v1582_v53 = vpop.f32.mrf.mxu1 }
 0xa29   : > { %v1695_v54 = vpop.eup %1694 }
 0xa2a   : > { %v1205_v56 = vadd.f32 1.0, %v1695_v54 }
 0xa2c   : > { %v1206_v0 = vmul.f32 %v1205_v56, %v1202_v55 }
 0xa2e   : > { %v1207_v57 = vpack.c.bf16 %v1206_v0, %v1206_v0 }
 0xa30   : > { %1592 = vmatmul.mubr.msk.bf16.vlgmr.msra.gmra.mxu0 %vm1244_vm6, %v1207_v57 }
 0xaf0   : > { %v1282_v59 = vpop.f32.mrf.mxu0 }
 0xaf1   : > { %v1283_v60 = vadd.f32 %v1448_v58, %v1282_v59 }
 0xaf2   : > { %v1593_v61 = vpop.f32.mrf.mxu0 }
 0xaf3   : > { %v1288_v23 = vadd.f32 %v1283_v60, %v1134_v41 }
 0xaf4   : > { %v1285_v62 = vpop.f32.mrf.mxu0 }
 0xaf5   : > { %v1289_v63 = vsel %vm409_vm1, %v1288_v23, 0.0 }
 0xaf6   : > { %1290 = vadd.xlane.f32.xlu1 %v1289_v63  ;;  %v1594_v9 = vpop.f32.mrf.mxu0 }
 0xb7f   : > { %v1291_v1 = vpop.xlane.xlu1 %1290 }
 0xb80   : > { %v1292_v2 = vmul.f32 0.03125, %v1291_v1 }
 0xb82   : > { %v1293_v4 = vsub.f32 %v1288_v23, %v1292_v2 }
 0xb84   : > { %v1294_v5 = vmul.f32 %v1293_v4, %v1293_v4 }
 0xb86   : > { %v1295_v6 = vsel %vm409_vm1, %v1294_v5, 0.0 }
 0xb87   : > { %1296 = vadd.xlane.f32.xlu1 %v1295_v6 }
 0xc10   : > { %v1297_v7 = vpop.xlane.xlu1 %1296 }
 0xc11   : > { %v1298_v8 = vmul.f32 0.03125, %v1297_v7 }
 0xc13   : > { %v1299_v10 = vadd.f32 1e-12, %v1298_v8 }
 0xc15   : > { %1696 = vrsqrt.f32 %v1299_v10 }
 0xc22   : > { %v1697_v11 = vpop.eup %1696 }
 0xc23   : > { %v1301_v13 = vmul.f32 %v1697_v11, %v1293_v4 }
 0xc25   : > { %v1306_v15 = vmul.f32 %v1454_v12, %v1301_v13 }
 0xc27   : > { %v1311_v16 = vadd.f32 %v1455_v14, %v1306_v15 }
 0xc29   : > { %1312 = vst.msk [vmem:[%s372_s24] sm:$0xff] %vm409_vm1, %v1311_v16 }
 0xc2a   : > { %1765 = shalt.err (!%p1762_p5)
}
 0xc2b   : > { %s1766_s17 = scalar_lea.hbm %s1325_s21, 128  ;;  %s1770_s23 = scalar_lea.hbm %s2238_s9, 256 }
 0xc2c   : > { %p1767_p9 = scmp.ne.s32.totalorder %s1325_s21, %s1766_s17  ;;  %p1771_p4 = scmp.lt.s32.totalorder %s1325_s21, %s2238_s9 }
 0xc2d   : > { %p1772_p6 = scmp.lt.s32.totalorder %s1770_s23, %s1766_s17 }
 0xc2e   : > { %p1768_p12 = pnand %p1767_p9, %p2262_p11 }
 0xc2f   : > { %p1773_p8 = por %p1772_p6, %p1771_p4 }
 0xc30   : > { %p1769_p1 = pneg %p1768_p12 }
 0xc32   : > { %p1774_p3 = pnand %p1773_p8, %p1769_p1 }
 0xc34   : > { %1777 = shalt.err (!%p1774_p3)
}
 0xc35   : > { %1601 = dma.vmem_to_hbm [thread:$0]  (%p2262_p11), %s1328_s20, 128, %s1325_s21, %s1314_s27  }
 0xc36 PF: > { %s2263_s28 = sld [smem:[#allocation11_spill]]  ;;  %s1339_s24 = sand.u32 1, %s1808_s30  }
 0xc37   : > { %p2265_p10 = scmp.ge.s32.totalorder %s1820_s12, 2  ;;  %s1340_s19 = scalar_lea.sflag [#allocation4], %s1339_s24 }
 0xc3c   : > { %p2264_p7 = scmp.ne.s32.totalorder %s2263_s28, 0 }
 0xc3e   : > { %p1612_p2 = pnand %p2265_p10, %p2264_p7 }
 0xc40   : > { %p1613_p13 = pneg %p1612_p2 }
 0xc42   : > { %1803 = dma.done.wait (%p1613_p13), %s1340_s19, 128  }
 0xc43   : > { %1805 = vsyncadd (%p1613_p13), %s1340_s19, 4294967168  ;;  %s2266_s12 = sld [smem:[#allocation12_spill]]  ;;  %s2268_s30 = smov %s1812_s10 }
 0xc44   : > { %s2267_s18 = sld [smem:[#allocation13_spill]]  ;;  %s2269_s10 = smov %s1816_s11 }
 0xc49   : > { %p23_p0 = scmp.ge.s32.totalorder %s2266_s12, 4  }
 0xc4a   : > { %s2270_s11 = smov %s2267_s18 }
 0xc4b   :  { %25 = sbr.rel (!%p23_p0) target bundleno = 8 (0x8), region = 108 }
 0xc50   :  { %1345 = vsyncpa [#allocation3], 1 }
 0xc51   :  { %1347 = vsyncpa [#allocation3 + $0x1], 1 }
 0xc52   :  { %1348 = vsyncpa [#allocation6], 1 }
 0xc53   :  { %1349 = vsyncpa [#allocation4], 1 }
 0xc54   :  { %1351 = vsyncpa [#allocation4 + $0x1], 1 }

</bundles_post_ra>
